<compile_context>
chip_gen: v5e
topology: v5e:2x2
jax: 0.10.0
libtpu: 0.0.40
codegen_flags: <defaults>
</compile_context>

<pallas_src>
import math
import functools

import numpy as np
import jax
import jax.numpy as jnp
from jax import lax
from jax.experimental import pallas as pl
from jax.experimental.pallas import tpu as pltpu

LANE = 128


def mha_kernel(params_ref, mask_ref, q_ref, k_ref, v_ref, o_ref, *,
               seq_real, scale_qk, scale_out):
    """One batch-block.  All 2-D tensors are (bb, S): sequence on the 128-lane axis.

    params_ref : (8,) f32 SMEM   -> [wq, bq, wk, bk, wv, bv, wo, bo] (scalars, d_model==1)
    mask_ref   : (bb, S) int32   module mask, 0 at padded columns
    q/k/v_ref  : (bb, S) f32
    o_ref      : (bb, S) f32     queries on the lane axis (full-width store)
    """
    wq = params_ref[0]
    bq = params_ref[1]
    wk = params_ref[2]
    bk = params_ref[3]
    wv = params_ref[4]
    bv = params_ref[5]
    wo = params_ref[6]
    bo = params_ref[7]

    bb, S = q_ref.shape

    # Module mask quirk (head_dim == 1): the where()-broadcast of q/k against the
    # (hd, seq) mask makes QK^T exactly n_unmasked * q_i * k_l.
    m = (mask_ref[...] != 0).astype(jnp.float32)            # (bb, S); padded cols are 0
    n_unmasked = jnp.sum(m, axis=-1, keepdims=True)         # (bb, 1)   XLU lane reduce

    # Scalar-weight projections: pure VPU (no degenerate K=1 MXU matmuls).
    qh = q_ref[...] * wq + bq
    kh = k_ref[...] * wk + bk
    vh = v_ref[...] * wv + bv

    # Fold the mask count and 1/sqrt(hd) into the O(S) query row, not O(S^2) scores.
    qs = qh * (n_unmasked * scale_qk)                        # (bb, S)

    # scores[b, i, l] = qs[b, i] * kh[b, l]: broadcast outer product on the VPU.
    scores = qs[:, :, None] * kh[:, None, :]                 # (bb, S, S)

    # Drop padded key columns (lane padding) from the softmax.
    key_valid = lax.broadcasted_iota(jnp.int32, (1, 1, S), 2) < seq_real
    scores = jnp.where(key_valid, scores, -jnp.inf)

    # Softmax over keys (lane axis), f32 throughout (v5e has no bf16 VPU/EUP path).
    smax = jnp.max(scores, axis=-1, keepdims=True)           # (bb, S, 1)
    e = jnp.exp(scores - smax)                               # EUP
    denom = jnp.sum(e, axis=-1)                              # (bb, S)
    num = jnp.sum(e * vh[:, None, :], axis=-1)               # (bb, S)

    # Fold d_model**-0.5 and the 1x1 out-projection weight into the normalization.
    inv = pl.reciprocal(denom, approx=True) * (wo * scale_out)
    o_ref[...] = num * inv + bo                              # (bb, S)


def multi_head_attention(q, k, v, mask, params, nhead):
    bs, seq, dm = q.shape
    hd = dm // nhead
    assert nhead * hd == dm
    # The torch mask-broadcast quirk is only well-formed for head_dim == 1, and the
    # scalar-parameter kernel additionally assumes d_model == 1 (the module's config).
    assert dm == 1 and nhead == 1, "kernel specializes to the module's d_model=1, nhead=1"

    # Free reshapes (trailing unit feature dim): no extra HBM transpose passes.
    q2 = q.reshape(bs, seq).astype(jnp.float32)
    k2 = k.reshape(bs, seq).astype(jnp.float32)
    v2 = v.reshape(bs, seq).astype(jnp.float32)
    m2 = mask.reshape(bs, seq).astype(jnp.int32)

    # Lane-dense padding: seq -> multiple of 128 lanes; 8-row sublane blocks for bs > 8.
    S = max(LANE, ((seq + LANE - 1) // LANE) * LANE)
    if bs <= 8:
        bb, bs_pad = bs, bs                    # full-dim block (satisfies the sublane rule)
    else:
        bb = 8
        bs_pad = ((bs + 7) // 8) * 8

    def pad2(x):
        return jnp.pad(x, ((0, bs_pad - bs), (0, S - seq)))   # mask pads with 0

    q2, k2, v2, m2 = pad2(q2), pad2(k2), pad2(v2), pad2(m2)

    # Single (8,) f32 SMEM operand carrying all scalar parameters.
    packed = jnp.stack([params['wq'][0, 0], params['bq'][0],
                        params['wk'][0, 0], params['bk'][0],
                        params['wv'][0, 0], params['bv'][0],
                        params['wo'][0, 0], params['bo'][0]]).astype(jnp.float32)

    act_spec = pl.BlockSpec((bb, S), lambda b: (b, 0))

    kernel = functools.partial(mha_kernel,
                               seq_real=seq,
                               scale_qk=1.0 / math.sqrt(hd),
                               scale_out=dm ** (-0.5))

    # VMEM budget derived from actual footprint (double-buffered (bb,S) operands +
    # a few (bb,S,S) f32 temporaries), generous headroom, well under v7x's 64 MiB.
    est = 2 * 5 * bb * S * 4 + 8 * bb * S * S * 4
    vmem_limit = int(min(max(4 * est, 16 * 1024 * 1024), 48 * 1024 * 1024))

    outp = pl.pallas_call(
        kernel,
        out_shape=jax.ShapeDtypeStruct((bs_pad, S), jnp.float32),
        grid=(bs_pad // bb,),
        in_specs=[pl.BlockSpec(memory_space=pltpu.MemorySpace.SMEM),   # packed params
                  act_spec,                                            # mask
                  act_spec, act_spec, act_spec],                       # q, k, v
        out_specs=act_spec,
        compiler_params=pltpu.CompilerParams(
            dimension_semantics=("parallel",),
            vmem_limit_bytes=vmem_limit),
    )(packed, m2, q2, k2, v2)

    # Slice off padding; (bs, seq) -> (bs, seq, 1) is a free reshape.
    return outp[:bs, :seq].reshape(bs, seq, dm).astype(q.dtype)


def ref_forward(q, k, v, mask, params, nhead):
    """Pure-JAX mirror of the PyTorch forward (implements the mask quirk literally)."""
    bs, seq, dm = q.shape
    hd = dm // nhead

    def lin(x, w, b):
        return x @ w.T + b.reshape(1, 1, dm)

    qh = lin(q, params['wq'], params['bq']).reshape(bs, seq, nhead, hd).transpose(0, 2, 1, 3)
    kh = lin(k, params['wk'], params['bk']).reshape(bs, seq, nhead, hd).transpose(0, 2, 1, 3)
    vh = lin(v, params['wv'], params['bv']).reshape(bs, seq, nhead, hd).transpose(0, 2, 1, 3)

    am = jnp.broadcast_to((mask == 0).reshape(bs, 1, 1, seq), (bs, nhead, hd, seq))
    qz = jnp.where(am, 0.0, qh)     # broadcasts to (bs, nhead, seq, seq) when hd == 1
    kz = jnp.where(am, 0.0, kh)

    scale = 1.0 / math.sqrt(hd)
    qk = jnp.matmul(qz, jnp.swapaxes(kz, 2, 3)) * scale
    attn = jax.nn.softmax(qk, axis=3)
    out = jnp.matmul(attn, vh)
    out = out.transpose(0, 2, 1, 3).reshape(bs, -1, dm)
    out = out * (dm ** (-0.5))
    return out @ params['wo'].T + params['bo'].reshape(1, 1, dm)


def init_params(key, dm):
    """Deterministic init mimicking torch.nn.Linear's uniform(-1/sqrt(in), 1/sqrt(in)).

    Weights in torch's native (out, in) orientation; biases as (dm,) vectors.
    """
    bound = 1.0 / math.sqrt(dm)
    keys = jax.random.split(key, 8)

    def u(k, shape):
        return jax.random.uniform(k, shape, jnp.float32, minval=-bound, maxval=bound)

    return {
        'wq': u(keys[0], (dm, dm)), 'bq': u(keys[1], (dm,)),
        'wk': u(keys[2], (dm, dm)), 'bk': u(keys[3], (dm,)),
        'wv': u(keys[4], (dm, dm)), 'bv': u(keys[5], (dm,)),
        'wo': u(keys[6], (dm, dm)), 'bo': u(keys[7], (dm,)),
    }


if __name__ == "__main__":
    d_model = 1
    nhead = 1
    bs, seq = 1, 10

    key = jax.random.PRNGKey(0)
    kq, kk, kv, kp = jax.random.split(key, 4)
    q = jax.random.normal(kq, (bs, seq, d_model), jnp.float32)
    k = jax.random.normal(kk, (bs, seq, d_model), jnp.float32)
    v = jax.random.normal(kv, (bs, seq, d_model), jnp.float32)
    mask = jnp.array([[0, 1, 1, 1, 1, 1, 1, 1, 1, 1]], dtype=jnp.int32)

    params = init_params(kp, d_model)

    mha = jax.jit(lambda q_, k_, v_, m_, p_: multi_head_attention(q_, k_, v_, m_, p_, nhead))
    out = jax.block_until_ready(mha(q, k, v, mask, params))

    ref = ref_forward(q, k, v, mask, params, nhead)
    # Tolerance covers the EUP approximate reciprocal used for the softmax
    # normalization and the folded out-projection scale; everything else is exact f32.
    np.testing.assert_allclose(np.asarray(out), np.asarray(ref), rtol=2e-3, atol=2e-3)

    print("KERNEL_OK")
</pallas_src>

<mosaic_0001>
module attributes {stable_mosaic.version = 11 : i64} {
  func.func @mha_kernel(%arg0: i32, %arg1: memref<8xf32, #tpu.memory_space<smem>>, %arg2: memref<1x128xi32, #tpu.memory_space<vmem>>, %arg3: memref<1x128xf32, #tpu.memory_space<vmem>>, %arg4: memref<1x128xf32, #tpu.memory_space<vmem>>, %arg5: memref<1x128xf32, #tpu.memory_space<vmem>>, %arg6: memref<1x128xf32, #tpu.memory_space<vmem>>) attributes {dimension_semantics = [#tpu.dimension_semantics<parallel>], iteration_bounds = array<i64: 1>, scalar_prefetch = 0 : i64, scratch_operands = 0 : i64, tpu.core_type = #tpu.core_type<tc>, window_params = [{transform_indices = @transform_0, window_bounds = array<i64: 8>}, {transform_indices = @transform_1, window_bounds = array<i64: 1, 128>}, {transform_indices = @transform_2, window_bounds = array<i64: 1, 128>}, {transform_indices = @transform_3, window_bounds = array<i64: 1, 128>}, {transform_indices = @transform_4, window_bounds = array<i64: 1, 128>}, {transform_indices = @transform_5, window_bounds = array<i64: 1, 128>}]} {
    %c0 = arith.constant 0 : index
    %0 = memref.load %arg1[%c0] : memref<8xf32, #tpu.memory_space<smem>>
    %c1 = arith.constant 1 : index
    %1 = memref.load %arg1[%c1] : memref<8xf32, #tpu.memory_space<smem>>
    %c2 = arith.constant 2 : index
    %2 = memref.load %arg1[%c2] : memref<8xf32, #tpu.memory_space<smem>>
    %c3 = arith.constant 3 : index
    %3 = memref.load %arg1[%c3] : memref<8xf32, #tpu.memory_space<smem>>
    %c4 = arith.constant 4 : index
    %4 = memref.load %arg1[%c4] : memref<8xf32, #tpu.memory_space<smem>>
    %c5 = arith.constant 5 : index
    %5 = memref.load %arg1[%c5] : memref<8xf32, #tpu.memory_space<smem>>
    %c6 = arith.constant 6 : index
    %6 = memref.load %arg1[%c6] : memref<8xf32, #tpu.memory_space<smem>>
    %c7 = arith.constant 7 : index
    %7 = memref.load %arg1[%c7] : memref<8xf32, #tpu.memory_space<smem>>
    %c0_0 = arith.constant 0 : index
    %c0_1 = arith.constant 0 : index
    %8 = vector.load %arg2[%c0_0, %c0_1] : memref<1x128xi32, #tpu.memory_space<vmem>>, vector<1x128xi32>
    %c0_i32 = arith.constant 0 : i32
    %9 = vector.broadcast %c0_i32 : i32 to vector<1x128xi32>
    %10 = arith.cmpi ne, %8, %9 : vector<1x128xi32>
    %11 = arith.extui %10 : vector<1x128xi1> to vector<1x128xi32>
    %12 = arith.sitofp %11 : vector<1x128xi32> to vector<1x128xf32>
    %cst = arith.constant dense<0.000000e+00> : vector<1xf32>
    %13 = vector.multi_reduction <add>, %12, %cst [1] : vector<1x128xf32> to vector<1xf32>
    %14 = vector.shape_cast %13 : vector<1xf32> to vector<1x1xf32>
    %c0_2 = arith.constant 0 : index
    %c0_3 = arith.constant 0 : index
    %15 = vector.load %arg3[%c0_2, %c0_3] : memref<1x128xf32, #tpu.memory_space<vmem>>, vector<1x128xf32>
    %16 = vector.broadcast %0 : f32 to vector<1x128xf32>
    %17 = arith.mulf %15, %16 : vector<1x128xf32>
    %18 = vector.broadcast %1 : f32 to vector<1x128xf32>
    %19 = arith.addf %17, %18 : vector<1x128xf32>
    %c0_4 = arith.constant 0 : index
    %c0_5 = arith.constant 0 : index
    %20 = vector.load %arg4[%c0_4, %c0_5] : memref<1x128xf32, #tpu.memory_space<vmem>>, vector<1x128xf32>
    %21 = vector.broadcast %2 : f32 to vector<1x128xf32>
    %22 = arith.mulf %20, %21 : vector<1x128xf32>
    %23 = vector.broadcast %3 : f32 to vector<1x128xf32>
    %24 = arith.addf %22, %23 : vector<1x128xf32>
    %c0_6 = arith.constant 0 : index
    %c0_7 = arith.constant 0 : index
    %25 = vector.load %arg5[%c0_6, %c0_7] : memref<1x128xf32, #tpu.memory_space<vmem>>, vector<1x128xf32>
    %26 = vector.broadcast %4 : f32 to vector<1x128xf32>
    %27 = arith.mulf %25, %26 : vector<1x128xf32>
    %28 = vector.broadcast %5 : f32 to vector<1x128xf32>
    %29 = arith.addf %27, %28 : vector<1x128xf32>
    %cst_8 = arith.constant 1.000000e+00 : f32
    %30 = vector.broadcast %cst_8 : f32 to vector<1x1xf32>
    %31 = arith.mulf %14, %30 : vector<1x1xf32>
    %32 = vector.broadcast %31 : vector<1x1xf32> to vector<1x128xf32>
    %33 = arith.mulf %19, %32 : vector<1x128xf32>
    %34 = vector.shape_cast %33 : vector<1x128xf32> to vector<1x128x1xf32>
    %35 = vector.shape_cast %24 : vector<1x128xf32> to vector<1x1x128xf32>
    %36 = vector.broadcast %34 : vector<1x128x1xf32> to vector<1x128x128xf32>
    %37 = vector.broadcast %35 : vector<1x1x128xf32> to vector<1x128x128xf32>
    %38 = arith.mulf %36, %37 : vector<1x128x128xf32>
    %39 = tpu.iota {dimensions = array<i32: 2>} : vector<1x1x128xi32>
    %c10_i32 = arith.constant 10 : i32
    %40 = vector.broadcast %c10_i32 : i32 to vector<1x1x128xi32>
    %41 = arith.cmpi slt, %39, %40 : vector<1x1x128xi32>
    %cst_9 = arith.constant 0xFF800000 : f32
    %42 = vector.shape_cast %41 : vector<1x1x128xi1> to vector<1x1x128xi1>
    %43 = vector.broadcast %42 : vector<1x1x128xi1> to vector<1x128x128xi1>
    %44 = vector.broadcast %cst_9 : f32 to vector<1x128x128xf32>
    %45 = arith.select %43, %38, %44 : vector<1x128x128xi1>, vector<1x128x128xf32>
    %cst_10 = arith.constant dense<0xFF800000> : vector<1x128xf32>
    %46 = vector.multi_reduction <maximumf>, %45, %cst_10 [2] : vector<1x128x128xf32> to vector<1x128xf32>
    %47 = vector.shape_cast %46 : vector<1x128xf32> to vector<1x128x1xf32>
    %48 = vector.broadcast %47 : vector<1x128x1xf32> to vector<1x128x128xf32>
    %49 = arith.subf %45, %48 : vector<1x128x128xf32>
    %50 = math.exp %49 : vector<1x128x128xf32>
    %cst_11 = arith.constant dense<0.000000e+00> : vector<1x128xf32>
    %51 = vector.multi_reduction <add>, %50, %cst_11 [2] : vector<1x128x128xf32> to vector<1x128xf32>
    %52 = vector.shape_cast %29 : vector<1x128xf32> to vector<1x1x128xf32>
    %53 = vector.broadcast %52 : vector<1x1x128xf32> to vector<1x128x128xf32>
    %54 = arith.mulf %50, %53 : vector<1x128x128xf32>
    %cst_12 = arith.constant dense<0.000000e+00> : vector<1x128xf32>
    %55 = vector.multi_reduction <add>, %54, %cst_12 [2] : vector<1x128x128xf32> to vector<1x128xf32>
    %56 = tpu.reciprocal %51 {approx = true} : vector<1x128xf32> -> vector<1x128xf32>
    %cst_13 = arith.constant 1.000000e+00 : f32
    %57 = arith.mulf %6, %cst_13 : f32
    %58 = vector.broadcast %57 : f32 to vector<1x128xf32>
    %59 = arith.mulf %56, %58 : vector<1x128xf32>
    %60 = arith.mulf %55, %59 : vector<1x128xf32>
    %61 = vector.broadcast %7 : f32 to vector<1x128xf32>
    %62 = arith.addf %60, %61 : vector<1x128xf32>
    %c0_14 = arith.constant 0 : index
    %c0_15 = arith.constant 0 : index
    %63 = vector.load %arg6[%c0_14, %c0_15] : memref<1x128xf32, #tpu.memory_space<vmem>>, vector<1x128xf32>
    tpu.vector_store %arg6[%c0_14, %c0_15], %62 {strides = array<i32>} : memref<1x128xf32, #tpu.memory_space<vmem>>, vector<1x128xf32>,
    return
  }
  func.func @transform_0(%arg0: i32) -> i32 {
    %c0_i32 = arith.constant 0 : i32
    %c0_i32_0 = arith.constant 0 : i32
    return %c0_i32 : i32
  }
  func.func @transform_1(%arg0: i32) -> (i32, i32) {
    %c0_i32 = arith.constant 0 : i32
    %c0_i32_0 = arith.constant 0 : i32
    return %arg0, %c0_i32 : i32, i32
  }
  func.func @transform_2(%arg0: i32) -> (i32, i32) {
    %c0_i32 = arith.constant 0 : i32
    %c0_i32_0 = arith.constant 0 : i32
    return %arg0, %c0_i32 : i32, i32
  }
  func.func @transform_3(%arg0: i32) -> (i32, i32) {
    %c0_i32 = arith.constant 0 : i32
    %c0_i32_0 = arith.constant 0 : i32
    return %arg0, %c0_i32 : i32, i32
  }
  func.func @transform_4(%arg0: i32) -> (i32, i32) {
    %c0_i32 = arith.constant 0 : i32
    %c0_i32_0 = arith.constant 0 : i32
    return %arg0, %c0_i32 : i32, i32
  }
  func.func @transform_5(%arg0: i32) -> (i32, i32) {
    %c0_i32 = arith.constant 0 : i32
    %c0_i32_0 = arith.constant 0 : i32
    return %arg0, %c0_i32 : i32, i32
  }
}

</mosaic_0001>

<bundles_post_ra>
// kernel: _lambda_.1
= control target key start
LH: loop header
LB: loop body
LE: loop exit
PB: predicated region body
PF: predicated region fallthrough
CT: control target
= control target key end

     0   :  { %10 = vsyncpa [#allocation3], 0  ;;  %s620_s21 = smov [#allocation2]   ;;  %s860_s0 = inlined_call_operand.vmem [shape: f32[8], index: 0, kind: input, shape index: {}]   ;;  %s861_s1 = inlined_call_operand.vmem [shape: s32[1,128], index: 1, kind: input, shape index: {}]   ;;  %s862_s2 = inlined_call_operand.vmem [shape: f32[1,128], index: 2, kind: input, shape index: {}]   ;;  %s863_s3 = inlined_call_operand.vmem [shape: f32[1,128], index: 3, kind: input, shape index: {}]   ;;  %s864_s4 = inlined_call_operand.vmem [shape: f32[1,128], index: 4, kind: input, shape index: {}]   ;;  %s865_s5 = inlined_call_operand.vmem [shape: f32[1,128], index: 5, kind: output, shape index: {}]  }
   0x1   :  { %s16_s20 = sshll.u32 %s860_s0, 4  ;;  %s17_s20 = int_to_ptr.vmem [resolvable:$true] %s16_s20 }
   0x2   :  { %19 = dma.vmem_to_smem %s17_s20, 16, %s620_s21, [#allocation3]  }
   0x3   :  { %618 = dma.done.wait [#allocation3], 16  }
   0x4   :  { %619 = vsyncadd [#allocation3], 4294967280 }
   0x5   :  { %32 = sfence }
   0x6   :  { %v41_v0 = vld [vmem:[%s861_s1] sm:$0x1]  ;;  %vm45_vm0 = vcmask 1040384   ;;  %v66_v1 = vlaneseq  ;;  %v621_v2 = vmov 0.0   ;;  %s33_s0 = sld [smem:[#allocation2]]  ;;  %vm450_vm3 = vcmask 130112  }
   0x7   :  { %vm42_vm1 = vcmp.ne.s32.totalorder %v41_v0, 0  ;;  %s515_s24 = sld [smem:[#allocation2 + $0x1]]  ;;  %v49_v8 = vld [vmem:[%s862_s2] sm:$0x1]  ;;  %vm454_vm4 = vcmask 195712   ;;  %vm458_vm5 = vcmask 261312  }
   0x8   :  { %v522_v3 = vsel %vm42_vm1, 1.0, %v621_v2  ;;  %v67_v4 = vshrl.u32 %v66_v1, 7  ;;  %s516_s1 = sld [smem:[#allocation2 + $0x2]]  ;;  %v54_v29 = vld [vmem:[%s863_s3] sm:$0x1]  ;;  %v666_v37 = vand.u32 127, %v66_v1 }
   0x9   :  { %v46_v5 = vsel %vm45_vm0, %v522_v3, 0.0  ;;  %s517_s2 = sld [smem:[#allocation2 + $0x3]]  ;;  %vm462_vm6 = vcmask 326912   ;;  %vm466_vm7 = vcmask 392512   ;;  %vm470_vm8 = vcmask 458112  }
   0xa   :  { %47 = vadd.xlane.f32.xlu0 %v46_v5  ;;  %v86_v6 = vadd.s32 24, %v67_v4  ;;  %v74_v7 = vadd.s32 8, %v67_v4  ;;  %v92_v16 = vadd.s32 32, %v67_v4  ;;  %v80_v17 = vadd.s32 16, %v67_v4  ;;  %s518_s3 = sld [smem:[#allocation2 + $0x4]] }
   0xb   :  { %525 = vset.pattern.permute.xlu0 %v67_v4  ;;  %v146_v18 = vadd.s32 104, %v67_v4  ;;  %v104_v19 = vadd.s32 48, %v67_v4  ;;  %v98_v20 = vadd.s32 40, %v67_v4  ;;  %v116_v21 = vadd.s32 64, %v67_v4  ;;  %s519_s29 = sld [smem:[#allocation2 + $0x5]] }
   0xc   :  { %528 = vset.pattern.permute.xlu2 %v86_v6  ;;  %526 = vset.pattern.permute.xlu1 %v74_v7  ;;  %v50_v9 = vstv %s33_s0  ;;  %v110_v22 = vadd.s32 56, %v67_v4  ;;  %v158_v23 = vadd.s32 120, %v67_v4  ;;  %v128_v24 = vadd.s32 80, %v67_v4  ;;  %s521_s7 = sld [smem:[#allocation2 + $0x7]] }
   0xd   :  { %v51_v10 = vmul.f32 %v50_v9, %v49_v8  ;;  %v52_v11 = vstv %s515_s24  ;;  %v122_v25 = vadd.s32 72, %v67_v4  ;;  %v140_v26 = vadd.s32 96, %v67_v4 }
   0xe   :  { %v134_v27 = vadd.s32 88, %v67_v4  ;;  %v152_v28 = vadd.s32 112, %v67_v4  ;;  %v55_v30 = vstv %s516_s1  ;;  %vm183_vm2 = vcmp.lt.s32.totalorder %v666_v37, 10 }
   0xf   :  { %v53_v12 = vadd.f32 %v52_v11, %v51_v10  ;;  %v56_v32 = vmul.f32 %v55_v30, %v54_v29  ;;  %v57_v33 = vstv %s517_s2  ;;  %vm474_vm9 = vcmask 523712  }
  0x10   :  { %vm478_vm10 = vcmask 589312   ;;  %vm482_vm11 = vcmask 654912   ;;  %vm486_vm12 = vcmask 720512   ;;  %vm490_vm13 = vcmask 786112  }
  0x11   :  { %v58_v35 = vadd.f32 %v57_v33, %v56_v32  ;;  %vm494_vm14 = vcmask 851712   ;;  %vm498_vm15 = vcmask 917312   ;;  %vm502_vm0 = vcmask 982912  }
  0x12   :  { %vm506_vm1 = vcmask 1048512  }
  0x13   :  { %v163_v38 = vperm.slane %v58_v35, 0 }
  0x7d   :  { %v48_v13 = vpop.xlane.xlu0 %47 }
  0x7e   :  { %v64_v14 = vmul.f32 %v53_v12, %v48_v13 }
  0x80   :  { %v65_v15 = vperm.slane %v64_v14, 0 }
  0x82   :  { %88 = vperm.xlu2 %528, %v65_v15   ;;  %76 = vperm.xlu1 %526, %v65_v15  }
  0x83   :  { %70 = vperm.xlu0 %525, %v65_v15  }
  0x8a   :  { %529 = vset.pattern.permute.xlu2 %v92_v16  ;;  %527 = vset.pattern.permute.xlu1 %v80_v17 }
  0x8b   :  { %538 = vset.pattern.permute.xlu0 %v146_v18 }
  0x92   :  { %94 = vperm.xlu2 %529, %v65_v15   ;;  %82 = vperm.xlu1 %527, %v65_v15  }
  0x93   :  { %148 = vperm.xlu0 %538, %v65_v15  }
  0x9a   :  { %531 = vset.pattern.permute.xlu2 %v104_v19  ;;  %530 = vset.pattern.permute.xlu1 %v98_v20 }
  0x9b   :  { %541 = vset.pattern.permute.xlu0 %v158_v23 }
  0xa2   :  { %106 = vperm.xlu2 %531, %v65_v15   ;;  %100 = vperm.xlu1 %530, %v65_v15  }
  0xaa   :  { %533 = vset.pattern.permute.xlu2 %v116_v21  ;;  %532 = vset.pattern.permute.xlu1 %v110_v22 }
  0xb2   :  { %118 = vperm.xlu2 %533, %v65_v15   ;;  %112 = vperm.xlu1 %532, %v65_v15  }
  0xba   :  { %535 = vset.pattern.permute.xlu2 %v128_v24  ;;  %534 = vset.pattern.permute.xlu1 %v122_v25 }
  0xc2   :  { %130 = vperm.xlu2 %535, %v65_v15   ;;  %124 = vperm.xlu1 %534, %v65_v15  }
  0xca   :  { %537 = vset.pattern.permute.xlu2 %v140_v26  ;;  %536 = vset.pattern.permute.xlu1 %v134_v27 }
  0xd2   :  { %142 = vperm.xlu2 %537, %v65_v15   ;;  %136 = vperm.xlu1 %536, %v65_v15  }
  0xda   :  { %540 = vset.pattern.permute.xlu2 %v158_v23  ;;  %539 = vset.pattern.permute.xlu1 %v152_v28 }
  0xdc   :  { %v89_v31 = vpop.permute.xlu2 %88 }
  0xdd   :  { %v168_v49 = vmul.f32 %v163_v38, %v89_v31 }
  0xdf   :  { %v682_v52 = vsel %vm183_vm2, %v168_v49, -inf }
  0xe2   :  { %160 = vperm.xlu2 %540, %v65_v15   ;;  %154 = vperm.xlu1 %539, %v65_v15  }
  0xec   :  { %v95_v36 = vpop.permute.xlu2 %94 }
  0xed   :  { %v169_v50 = vmul.f32 %v163_v38, %v95_v36 }
  0xef   :  { %v687_v53 = vsel %vm183_vm2, %v169_v50, -inf }
  0xf4   :  { %v77_v34 = vpop.permute.xlu1 %76 }
  0xf5   :  { %v71_v39 = vpop.permute.xlu0 %70  ;;  %v166_v42 = vmul.f32 %v163_v38, %v77_v34 }
  0xf6   :  { %v165_v43 = vmul.f32 %v163_v38, %v71_v39 }
  0xf7   :  { %v187_v46 = vsel %vm183_vm2, %v166_v42, -inf }
  0xf8   :  { %v186_v48 = vsel %vm183_vm2, %v165_v43, -inf }
  0xfc   :  { %v107_v45 = vpop.permute.xlu2 %106 }
  0xfd   :  { %v171_v47 = vmul.f32 %v163_v38, %v107_v45 }
  0xff   :  { %v677_v51 = vsel %vm183_vm2, %v171_v47, -inf }
 0x104   :  { %v83_v40 = vpop.permute.xlu1 %82 }
 0x105   :  { %v167_v41 = vmul.f32 %v163_v38, %v83_v40  ;;  %v149_v2 = vpop.permute.xlu0 %148 }
 0x106   :  { %v178_v3 = vmul.f32 %v163_v38, %v149_v2 }
 0x107   :  { %v188_v44 = vsel %vm183_vm2, %v167_v41, -inf }
 0x108   :  { %206 = vmax.xlane.f32.xlu0 %v188_v44  ;;  %v716_v7 = vsel %vm183_vm2, %v178_v3, -inf }
 0x10b   :  { %204 = vmax.xlane.f32.xlu2 %v187_v46 }
 0x10c   :  { %202 = vmax.xlane.f32.xlu1 %v186_v48  ;;  %v119_v57 = vpop.permute.xlu2 %118 }
 0x10d   :  { %v173_v58 = vmul.f32 %v163_v38, %v119_v57 }
 0x10f   :  { %v697_v59 = vsel %vm183_vm2, %v173_v58, -inf }
 0x110   :  { %214 = vmax.xlane.f32.xlu0 %v677_v51 }
 0x113   :  { %208 = vmax.xlane.f32.xlu2 %v682_v52 }
 0x114   :  { %v101_v54 = vpop.permute.xlu1 %100  ;;  %210 = vmax.xlane.f32.xlu1 %v687_v53 }
 0x115   :  { %v170_v55 = vmul.f32 %v163_v38, %v101_v54 }
 0x117   :  { %v692_v56 = vsel %vm183_vm2, %v170_v55, -inf }
 0x11b   :  { %212 = vmax.xlane.f32.xlu2 %v692_v56 }
 0x11c   :  { %v131_v63 = vpop.permute.xlu2 %130 }
 0x11d   :  { %v175_v0 = vmul.f32 %v163_v38, %v131_v63 }
 0x11f   :  { %v707_v1 = vsel %vm183_vm2, %v175_v0, -inf }
 0x123   :  { %218 = vmax.xlane.f32.xlu2 %v697_v59 }
 0x124   :  { %v113_v60 = vpop.permute.xlu1 %112 }
 0x125   :  { %v172_v61 = vmul.f32 %v163_v38, %v113_v60 }
 0x127   :  { %v702_v62 = vsel %vm183_vm2, %v172_v61, -inf }
 0x128   :  { %216 = vmax.xlane.f32.xlu1 %v702_v62 }
 0x12c   :  { %v143_v8 = vpop.permute.xlu2 %142 }
 0x12d   :  { %v177_v9 = vmul.f32 %v163_v38, %v143_v8 }
 0x12f   :  { %v722_v10 = vsel %vm183_vm2, %v177_v9, -inf }
 0x130   :  { %222 = vmax.xlane.f32.xlu1 %v707_v1 }
 0x134   :  { %v125_v4 = vpop.permute.xlu1 %124 }
 0x135   :  { %v174_v5 = vmul.f32 %v163_v38, %v125_v4 }
 0x137   :  { %v712_v6 = vsel %vm183_vm2, %v174_v5, -inf }
 0x138   :  { %220 = vmax.xlane.f32.xlu0 %v712_v6  ;;  %228 = vmax.xlane.f32.xlu1 %v716_v7 }
 0x13c   :  { %v161_v11 = vpop.permute.xlu2 %160 }
 0x13d   :  { %v180_v12 = vmul.f32 %v163_v38, %v161_v11 }
 0x13f   :  { %v731_v16 = vsel %vm183_vm2, %v180_v12, -inf }
 0x140   :  { %226 = vmax.xlane.f32.xlu0 %v722_v10 }
 0x144   :  { %v137_v13 = vpop.permute.xlu1 %136 }
 0x145   :  { %v176_v14 = vmul.f32 %v163_v38, %v137_v13 }
 0x147   :  { %v727_v15 = vsel %vm183_vm2, %v176_v14, -inf }
 0x148   :  { %224 = vmax.xlane.f32.xlu2 %v727_v15  ;;  %232 = vmax.xlane.f32.xlu0 %v731_v16 }
 0x154   :  { %v155_v17 = vpop.permute.xlu1 %154 }
 0x155   :  { %v179_v18 = vmul.f32 %v163_v38, %v155_v17  ;;  %v60_v17 = vstv %s518_s3 }
 0x157   :  { %v737_v19 = vsel %vm183_vm2, %v179_v18, -inf }
 0x158   :  { %230 = vmax.xlane.f32.xlu2 %v737_v19 }
 0x17b   :  { %v207_v20 = vpop.xlane.xlu0 %206 }
 0x17c   :  { %v236_v21 = vsub.f32 %v188_v44, %v207_v20 }
 0x17e   :  { %v254_v22 = vmul.f32 1.442695, %v236_v21  ;;  %v205_v23 = vpop.xlane.xlu2 %204 }
 0x17f   :  { %v235_v24 = vsub.f32 %v187_v46, %v205_v23  ;;  %v203_v25 = vpop.xlane.xlu1 %202 }
 0x180   :  { %542 = vpow2.f32 %v254_v22  ;;  %v234_v26 = vsub.f32 %v186_v48, %v203_v25 }
 0x181   :  { %v252_v27 = vmul.f32 1.442695, %v235_v24 }
 0x182   :  { %v250_v28 = vmul.f32 1.442695, %v234_v26 }
 0x183   :  { %544 = vpow2.f32 %v252_v27  ;;  %v215_v35 = vpop.xlane.xlu0 %214 }
 0x184   :  { %546 = vpow2.f32 %v250_v28  ;;  %v240_v40 = vsub.f32 %v677_v51, %v215_v35 }
 0x186   :  { %v740_v29 = vpop.eup %542  ;;  %v209_v30 = vpop.xlane.xlu2 %208  ;;  %v262_v43 = vmul.f32 1.442695, %v240_v40 }
 0x187   :  { %v237_v31 = vsub.f32 %v682_v52, %v209_v30  ;;  %v211_v32 = vpop.xlane.xlu1 %210  ;;  %286 = vadd.xlane.f32.xlu0 %v740_v29 }
 0x188   :  { %v238_v33 = vsub.f32 %v687_v53, %v211_v32 }
 0x189   :  { %v745_v34 = vpop.eup %544  ;;  %v256_v36 = vmul.f32 1.442695, %v237_v31 }
 0x18a   :  { %v747_v38 = vpop.eup %546  ;;  %v258_v39 = vmul.f32 1.442695, %v238_v33  ;;  %284 = vadd.xlane.f32.xlu2 %v745_v34 }
 0x18b   :  { %548 = vpow2.f32 %v256_v36  ;;  %282 = vadd.xlane.f32.xlu1 %v747_v38 }
 0x18c   :  { %550 = vpow2.f32 %v258_v39 }
 0x18e   :  { %v213_v41 = vpop.xlane.xlu2 %212 }
 0x18f   :  { %v239_v42 = vsub.f32 %v692_v56, %v213_v41 }
 0x191   :  { %v753_v44 = vpop.eup %548  ;;  %v260_v45 = vmul.f32 1.442695, %v239_v42 }
 0x192   :  { %v755_v46 = vpop.eup %550 }
 0x193   :  { %552 = vpow2.f32 %v260_v45  ;;  %290 = vadd.xlane.f32.xlu2 %v755_v46  ;;  %288 = vadd.xlane.f32.xlu1 %v753_v44 }
 0x194   :  { %554 = vpow2.f32 %v262_v43 }
 0x196   :  { %v219_v47 = vpop.xlane.xlu2 %218 }
 0x197   :  { %v242_v48 = vsub.f32 %v697_v59, %v219_v47 }
 0x199   :  { %v760_v49 = vpop.eup %552  ;;  %v266_v50 = vmul.f32 1.442695, %v242_v48 }
 0x19a   :  { %v762_v51 = vpop.eup %554  ;;  %292 = vadd.xlane.f32.xlu0 %v760_v49 }
 0x19b   :  { %556 = vpow2.f32 %v266_v50  ;;  %v217_v52 = vpop.xlane.xlu1 %216  ;;  %294 = vadd.xlane.f32.xlu1 %v762_v51 }
 0x19c   :  { %v241_v53 = vsub.f32 %v702_v62, %v217_v52 }
 0x19e   :  { %v264_v54 = vmul.f32 1.442695, %v241_v53 }
 0x1a0   :  { %558 = vpow2.f32 %v264_v54 }
 0x1a1   :  { %v557_v55 = vpop.eup %556 }
 0x1a2   :  { %298 = vadd.xlane.f32.xlu0 %v557_v55 }
 0x1a3   :  { %v223_v56 = vpop.xlane.xlu1 %222 }
 0x1a4   :  { %v244_v57 = vsub.f32 %v707_v1, %v223_v56 }
 0x1a6   :  { %v768_v58 = vpop.eup %558  ;;  %v270_v59 = vmul.f32 1.442695, %v244_v57 }
 0x1a7   :  { %296 = vadd.xlane.f32.xlu2 %v768_v58 }
 0x1a8   :  { %560 = vpow2.f32 %v270_v59 }
 0x1ab   :  { %v221_v60 = vpop.xlane.xlu0 %220  ;;  %v229_v11 = vpop.xlane.xlu1 %228 }
 0x1ac   :  { %v243_v61 = vsub.f32 %v712_v6, %v221_v60  ;;  %v247_v14 = vsub.f32 %v716_v7, %v229_v11 }
 0x1ae   :  { %v561_v63 = vpop.eup %560  ;;  %v268_v0 = vmul.f32 1.442695, %v243_v61  ;;  %v276_v18 = vmul.f32 1.442695, %v247_v14 }
 0x1af   :  { %302 = vadd.xlane.f32.xlu2 %v561_v63 }
 0x1b0   :  { %562 = vpow2.f32 %v268_v0 }
 0x1b3   :  { %v227_v62 = vpop.xlane.xlu0 %226 }
 0x1b4   :  { %v246_v2 = vsub.f32 %v722_v10, %v227_v62  ;;  %v59_v10 = vld [vmem:[%s864_s4] sm:$0x1]  ;;  %s520_s4 = sld [smem:[#allocation2 + $0x6]] }
 0x1b5   :  { %v61_v20 = vmul.f32 %v60_v17, %v59_v10  ;;  %v448_v10 = vadd.s32 4294967288, %v666_v37 }
 0x1b6   :  { %v274_v3 = vmul.f32 1.442695, %v246_v2  ;;  %v563_v4 = vpop.eup %562 }
 0x1b7   :  { %300 = vadd.xlane.f32.xlu1 %v563_v4 }
 0x1b8   :  { %564 = vpow2.f32 %v274_v3 }
 0x1ba   :  { %v798_v62 = vstv %s520_s4 }
 0x1bb   :  { %v225_v1 = vpop.xlane.xlu2 %224  ;;  %v233_v5 = vpop.xlane.xlu0 %232 }
 0x1bc   :  { %v245_v8 = vsub.f32 %v727_v15, %v225_v1  ;;  %v249_v9 = vsub.f32 %v731_v16, %v233_v5  ;;  %v62_v15 = vstv %s519_s29 }
 0x1bd   :  { %v63_v22 = vadd.f32 %v62_v15, %v61_v20 }
 0x1be   :  { %v565_v6 = vpop.eup %564  ;;  %v272_v12 = vmul.f32 1.442695, %v245_v8  ;;  %v280_v13 = vmul.f32 1.442695, %v249_v9 }
 0x1bf   :  { %306 = vadd.xlane.f32.xlu1 %v565_v6  ;;  %v315_v24 = vperm.slane %v63_v22, 0 }
 0x1c0   :  { %566 = vpow2.f32 %v272_v12  ;;  %v802_v12 = vstv %s521_s7 }
 0x1c1   :  { %568 = vpow2.f32 %v280_v13  ;;  %v317_v27 = vmul.f32 %v747_v38, %v315_v24  ;;  %v319_v28 = vmul.f32 %v740_v29, %v315_v24  ;;  %v321_v31 = vmul.f32 %v755_v46, %v315_v24 }
 0x1c2   :  { %570 = vpow2.f32 %v276_v18  ;;  %v318_v32 = vmul.f32 %v745_v34, %v315_v24  ;;  %v325_v33 = vmul.f32 %v557_v55, %v315_v24  ;;  %v320_v35 = vmul.f32 %v753_v44, %v315_v24 }
 0x1c3   :  { %v324_v36 = vmul.f32 %v768_v58, %v315_v24  ;;  %v327_v29 = vmul.f32 %v561_v63, %v315_v24  ;;  %v323_v39 = vmul.f32 %v762_v51, %v315_v24  ;;  %v326_v41 = vmul.f32 %v563_v4, %v315_v24 }
 0x1c4   :  { %v329_v42 = vmul.f32 %v565_v6, %v315_v24 }
 0x1c6   :  { %v567_v21 = vpop.eup %566 }
 0x1c7   :  { %v569_v16 = vpop.eup %568  ;;  %304 = vadd.xlane.f32.xlu0 %v567_v21  ;;  %v328_v38 = vmul.f32 %v567_v21, %v315_v24 }
 0x1c8   :  { %312 = vadd.xlane.f32.xlu1 %v569_v16  ;;  %v571_v25 = vpop.eup %570  ;;  %v332_v43 = vmul.f32 %v569_v16, %v315_v24 }
 0x1c9   :  { %v330_v34 = vmul.f32 %v571_v25, %v315_v24 }
 0x1cb   :  { %v231_v23 = vpop.xlane.xlu2 %230 }
 0x1cc   :  { %v248_v7 = vsub.f32 %v737_v19, %v231_v23  ;;  %v322_v19 = vmul.f32 %v760_v49, %v315_v24 }
 0x1ce   :  { %v278_v26 = vmul.f32 1.442695, %v248_v7 }
 0x1cf   :  { %308 = vadd.xlane.f32.xlu0 %v571_v25 }
 0x1d0   :  { %572 = vpow2.f32 %v278_v26  ;;  %333 = vadd.xlane.f32.xlu1 %v317_v27  ;;  %v456_v26 = vadd.s32 4294967272, %v666_v37 }
 0x1d6   :  { %v573_v30 = vpop.eup %572 }
 0x1d7   :  { %310 = vadd.xlane.f32.xlu2 %v573_v30  ;;  %337 = vadd.xlane.f32.xlu0 %v319_v28  ;;  %v331_v40 = vmul.f32 %v573_v30, %v315_v24  ;;  %v452_v30 = vadd.s32 4294967280, %v666_v37 }
 0x1d8   :  { %341 = vadd.xlane.f32.xlu1 %v321_v31 }
 0x1df   :  { %335 = vadd.xlane.f32.xlu2 %v318_v32  ;;  %343 = vadd.xlane.f32.xlu0 %v322_v19 }
 0x1e0   :  { %349 = vadd.xlane.f32.xlu1 %v325_v33 }
 0x1e7   :  { %339 = vadd.xlane.f32.xlu2 %v320_v35  ;;  %347 = vadd.xlane.f32.xlu0 %v324_v36 }
 0x1e8   :  { %355 = vadd.xlane.f32.xlu1 %v328_v38 }
 0x1ef   :  { %353 = vadd.xlane.f32.xlu0 %v327_v29  ;;  %345 = vadd.xlane.f32.xlu2 %v323_v39 }
 0x1f0   :  { %361 = vadd.xlane.f32.xlu1 %v331_v40 }
 0x1f7   :  { %359 = vadd.xlane.f32.xlu0 %v330_v34  ;;  %351 = vadd.xlane.f32.xlu2 %v326_v41  ;;  %v460_v34 = vadd.s32 4294967264, %v666_v37 }
 0x1fa   :  { %v287_v46 = vpop.xlane.xlu0 %286 }
 0x1fd   :  { %v285_v48 = vpop.xlane.xlu2 %284 }
 0x1fe   :  { %v283_v44 = vpop.xlane.xlu1 %282  ;;  %574 = vrcp.f32 %v285_v48 }
 0x1ff   :  { %357 = vadd.xlane.f32.xlu2 %v329_v42  ;;  %576 = vrcp.f32 %v283_v44 }
 0x200   :  { %578 = vrcp.f32 %v287_v46 }
 0x204   :  { %v575_v63 = vpop.eup %574 }
 0x205   :  { %v577_v0 = vpop.eup %576  ;;  %v383_v4 = vmul.f32 %v575_v63, %v798_v62 }
 0x206   :  { %v289_v45 = vpop.xlane.xlu1 %288  ;;  %v291_v51 = vpop.xlane.xlu2 %290  ;;  %v382_v5 = vmul.f32 %v577_v0, %v798_v62 }
 0x207   :  { %363 = vadd.xlane.f32.xlu2 %v332_v43  ;;  %580 = vrcp.f32 %v289_v45  ;;  %v579_v1 = vpop.eup %578  ;;  %v464_v45 = vadd.s32 4294967256, %v666_v37 }
 0x208   :  { %582 = vrcp.f32 %v291_v51  ;;  %v384_v13 = vmul.f32 %v579_v1, %v798_v62 }
 0x20d   :  { %v293_v49 = vpop.xlane.xlu0 %292  ;;  %v581_v11 = vpop.eup %580 }
 0x20e   :  { %v295_v47 = vpop.xlane.xlu1 %294  ;;  %584 = vrcp.f32 %v293_v49  ;;  %v583_v14 = vpop.eup %582  ;;  %v385_v18 = vmul.f32 %v581_v11, %v798_v62  ;;  %v468_v49 = vadd.s32 4294967248, %v666_v37  ;;  %v476_v11 = vadd.s32 4294967232, %v666_v37 }
 0x20f   :  { %586 = vrcp.f32 %v295_v47  ;;  %v386_v23 = vmul.f32 %v583_v14, %v798_v62 }
 0x214   :  { %v585_v22 = vpop.eup %584 }
 0x215   :  { %v299_v52 = vpop.xlane.xlu0 %298  ;;  %v587_v24 = vpop.eup %586  ;;  %v387_v33 = vmul.f32 %v585_v22, %v798_v62 }
 0x216   :  { %v388_v36 = vmul.f32 %v587_v24, %v798_v62 }
 0x21a   :  { %v297_v54 = vpop.xlane.xlu2 %296 }
 0x21b   :  { %588 = vrcp.f32 %v297_v54 }
 0x21c   :  { %590 = vrcp.f32 %v299_v52 }
 0x221   :  { %v589_v35 = vpop.eup %588 }
 0x222   :  { %v303_v57 = vpop.xlane.xlu2 %302  ;;  %v591_v40 = vpop.eup %590  ;;  %v389_v46 = vmul.f32 %v589_v35, %v798_v62 }
 0x22a   :  { %v301_v50 = vpop.xlane.xlu1 %300 }
 0x22b   :  { %592 = vrcp.f32 %v301_v50 }
 0x22c   :  { %594 = vrcp.f32 %v303_v57 }
 0x231   :  { %v593_v44 = vpop.eup %592 }
 0x232   :  { %v788_v53 = vpop.xlane.xlu1 %306  ;;  %v595_v57 = vpop.eup %594 }
 0x23a   :  { %v790_v55 = vpop.xlane.xlu0 %304 }
 0x23b   :  { %v792_v56 = vpop.xlane.xlu1 %312  ;;  %596 = vrcp.f32 %v790_v55  ;;  %v391_v55 = vmul.f32 %v593_v44, %v798_v62 }
 0x23c   :  { %598 = vrcp.f32 %v788_v53  ;;  %v392_v53 = vmul.f32 %v595_v57, %v798_v62 }
 0x242   :  { %v794_v58 = vpop.xlane.xlu0 %308 }
 0x243   :  { %v334_v61 = vpop.xlane.xlu1 %333  ;;  %600 = vrcp.f32 %v794_v58 }
 0x244   :  { %v398_v6 = vmul.f32 %v382_v5, %v334_v61  ;;  %v390_v61 = vmul.f32 %v591_v40, %v798_v62  ;;  %v472_v5 = vadd.s32 4294967240, %v666_v37 }
 0x246   :  { %v415_v21 = vadd.f32 %v802_v12, %v398_v6 }
 0x248   :  { %v447_v32 = vperm.slane %v415_v21, %v666_v37 }
 0x24a   :  { %v796_v59 = vpop.xlane.xlu2 %310  ;;  %v338_v60 = vpop.xlane.xlu0 %337 }
 0x24b   :  { %v342_v8 = vpop.xlane.xlu1 %341  ;;  %v400_v20 = vmul.f32 %v384_v13, %v338_v60  ;;  %602 = vrcp.f32 %v796_v59  ;;  %v480_v13 = vadd.s32 4294967224, %v666_v37 }
 0x24c   :  { %v402_v28 = vmul.f32 %v386_v23, %v342_v8  ;;  %604 = vrcp.f32 %v792_v56 }
 0x24d   :  { %v417_v31 = vadd.f32 %v802_v12, %v400_v20 }
 0x24e   :  { %v419_v41 = vadd.f32 %v802_v12, %v402_v28 }
 0x24f   :  { %v453_v42 = vperm.slane %v417_v31, %v452_v30 }
 0x250   :  { %v461_v60 = vperm.slane %v419_v41, %v460_v34 }
 0x252   :  { %v336_v2 = vpop.xlane.xlu2 %335  ;;  %v344_v3 = vpop.xlane.xlu0 %343 }
 0x253   :  { %v399_v9 = vmul.f32 %v383_v4, %v336_v2  ;;  %v350_v19 = vpop.xlane.xlu1 %349  ;;  %v403_v29 = vmul.f32 %v387_v33, %v344_v3 }
 0x254   :  { %v406_v0 = vmul.f32 %v390_v61, %v350_v19  ;;  %v492_v19 = vadd.s32 4294967200, %v666_v37  ;;  %v504_v61 = vadd.s32 4294967176, %v666_v37 }
 0x255   :  { %v416_v17 = vadd.f32 %v802_v12, %v399_v9  ;;  %v420_v50 = vadd.f32 %v802_v12, %v403_v29  ;;  %v597_v9 = vpop.eup %596 }
 0x256   :  { %v599_v20 = vpop.eup %598 }
 0x257   :  { %v449_v25 = vperm.slane %v416_v17, %v448_v10  ;;  %v465_v4 = vperm.slane %v420_v50, %v464_v45  ;;  %v423_v10 = vadd.f32 %v802_v12, %v406_v0  ;;  %v601_v22 = vpop.eup %600  ;;  %v394_v31 = vmul.f32 %v599_v20, %v798_v62 }
 0x258   :  { %v603_v28 = vpop.eup %602  ;;  %v395_v30 = vmul.f32 %v601_v22, %v798_v62  ;;  %v496_v45 = vadd.s32 4294967192, %v666_v37 }
 0x259   :  { %v451_v38 = vsel %vm450_vm3, %v449_v25, %v447_v32  ;;  %v477_v24 = vperm.slane %v423_v10, %v476_v11  ;;  %v484_v25 = vadd.s32 4294967216, %v666_v37  ;;  %v488_v32 = vadd.s32 4294967208, %v666_v37  ;;  %v605_v40 = vpop.eup %604 }
 0x25a   :  { %v340_v15 = vpop.xlane.xlu2 %339  ;;  %v348_v7 = vpop.xlane.xlu0 %347  ;;  %v455_v48 = vsel %vm454_vm4, %v453_v42, %v451_v38  ;;  %v396_v34 = vmul.f32 %v603_v28, %v798_v62  ;;  %v397_v50 = vmul.f32 %v605_v40, %v798_v62 }
 0x25b   :  { %v401_v16 = vmul.f32 %v385_v18, %v340_v15  ;;  %v405_v52 = vmul.f32 %v389_v46, %v348_v7  ;;  %v356_v1 = vpop.xlane.xlu1 %355  ;;  %v393_v15 = vmul.f32 %v597_v9, %v798_v62 }
 0x25d   :  { %v418_v27 = vadd.f32 %v802_v12, %v401_v16  ;;  %v422_v8 = vadd.f32 %v802_v12, %v405_v52  ;;  %v409_v59 = vmul.f32 %v393_v15, %v356_v1 }
 0x25f   :  { %v457_v39 = vperm.slane %v418_v27, %v456_v26  ;;  %v473_v21 = vperm.slane %v422_v8, %v472_v5  ;;  %v426_v35 = vadd.f32 %v802_v12, %v409_v59 }
 0x261   :  { %v459_v51 = vsel %vm458_vm5, %v457_v39, %v455_v48  ;;  %v489_v46 = vperm.slane %v426_v35, %v488_v32 }
 0x262   :  { %v346_v43 = vpop.xlane.xlu2 %345  ;;  %v354_v63 = vpop.xlane.xlu0 %353  ;;  %v463_v2 = vsel %vm462_vm6, %v461_v60, %v459_v51  ;;  %v500_v51 = vadd.s32 4294967184, %v666_v37 }
 0x263   :  { %v404_v47 = vmul.f32 %v388_v36, %v346_v43  ;;  %v467_v58 = vsel %vm466_vm7, %v465_v4, %v463_v2  ;;  %v408_v18 = vmul.f32 %v392_v53, %v354_v63  ;;  %v362_v36 = vpop.xlane.xlu1 %361 }
 0x264   :  { %v412_v43 = vmul.f32 %v396_v34, %v362_v36 }
 0x265   :  { %v421_v54 = vadd.f32 %v802_v12, %v404_v47  ;;  %v425_v26 = vadd.f32 %v802_v12, %v408_v18 }
 0x266   :  { %v429_v52 = vadd.f32 %v802_v12, %v412_v43 }
 0x267   :  { %v469_v3 = vperm.slane %v421_v54, %v468_v49  ;;  %v485_v41 = vperm.slane %v425_v26, %v484_v25 }
 0x268   :  { %v501_v2 = vperm.slane %v429_v52, %v500_v51 }
 0x269   :  { %v471_v17 = vsel %vm470_vm8, %v469_v3, %v467_v58 }
 0x26a   :  { %v352_v6 = vpop.xlane.xlu2 %351  ;;  %v475_v23 = vsel %vm474_vm9, %v473_v21, %v471_v17  ;;  %v360_v27 = vpop.xlane.xlu0 %359 }
 0x26b   :  { %v407_v14 = vmul.f32 %v391_v55, %v352_v6  ;;  %v479_v56 = vsel %vm478_vm10, %v477_v24, %v475_v23  ;;  %v411_v29 = vmul.f32 %v395_v30, %v360_v27 }
 0x26d   :  { %v424_v16 = vadd.f32 %v802_v12, %v407_v14  ;;  %v428_v47 = vadd.f32 %v802_v12, %v411_v29 }
 0x26f   :  { %v481_v7 = vperm.slane %v424_v16, %v480_v13  ;;  %v497_v60 = vperm.slane %v428_v47, %v496_v45 }
 0x271   :  { %v483_v38 = vsel %vm482_vm11, %v481_v7, %v479_v56 }
 0x272   :  { %v358_v33 = vpop.xlane.xlu2 %357  ;;  %v487_v44 = vsel %vm486_vm12, %v485_v41, %v483_v38 }
 0x273   :  { %v410_v39 = vmul.f32 %v394_v31, %v358_v33  ;;  %v491_v49 = vsel %vm490_vm13, %v489_v46, %v487_v44 }
 0x275   :  { %v427_v42 = vadd.f32 %v802_v12, %v410_v39 }
 0x277   :  { %v493_v48 = vperm.slane %v427_v42, %v492_v19 }
 0x279   :  { %v495_v54 = vsel %vm494_vm14, %v493_v48, %v491_v49 }
 0x27a   :  { %v364_v57 = vpop.xlane.xlu2 %363  ;;  %v499_v55 = vsel %vm498_vm15, %v497_v60, %v495_v54 }
 0x27b   :  { %v413_v63 = vmul.f32 %v397_v50, %v364_v57  ;;  %v503_v4 = vsel %vm502_vm0, %v501_v2, %v499_v55 }
 0x27d   :  { %v430_v0 = vadd.f32 %v802_v12, %v413_v63 }
 0x27f   :  { %v505_v3 = vperm.slane %v430_v0, %v504_v61 }
 0x281   :  { %v507_v62 = vsel %vm506_vm1, %v505_v3, %v503_v4 }
 0x282   :  { %509 = vst [vmem:[%s865_s5] sm:$0x1] %v507_v62 }
 0x283   :  { %514 = vsyncpa [#allocation3], 1 }

</bundles_post_ra>
